<compile_context>
chip_gen: v7x
topology: tpu7x:2x2x1
jax: 0.10.0
libtpu: 0.0.40
codegen_flags: <defaults>
</compile_context>

<pallas_src>
import functools
import math

import jax
import jax.numpy as jnp
import numpy as np
from jax.experimental import pallas as pl
from jax.experimental.pallas import tpu as pltpu

F32 = jnp.float32
_VMEM_LIMIT = 32 * 1024 * 1024


def _round_up(x, m):
    return ((x + m - 1) // m) * m


def _rnd128(x):
    return _round_up(x, 128)


def _pick_tile(dim, cap):
    """Largest tile <= cap dividing dim (padded dims are 128-multiples, so 128 always works)."""
    if dim <= cap:
        return dim
    for t in (512, 384, 256, 128):
        if t <= cap and dim % t == 0:
            return t
    return dim


# ----------------------------------------------------------------------------
# Matmul kernel: grid (M, N, K) tiles, K innermost, f32 accumulator, fused bias / SiLU
# ----------------------------------------------------------------------------
def _matmul_kernel(x_ref, w_ref, b_ref, o_ref, acc_ref, *, act, k_steps):
    k = pl.program_id(2)

    @pl.when(k == 0)
    def _():
        acc_ref[...] = jnp.zeros_like(acc_ref)

    acc_ref[...] += jnp.dot(x_ref[...], w_ref[...], preferred_element_type=jnp.float32)

    @pl.when(k == k_steps - 1)
    def _():
        y = acc_ref[...] + b_ref[...]
        if act == "silu":
            y = y * (1.0 / (1.0 + jnp.exp(-y)))
        o_ref[...] = y


@functools.lru_cache(maxsize=None)
def _matmul_fn(Mp, Kp, Np, act):
    TM = _pick_tile(Mp, 256)
    TK = _pick_tile(Kp, 512)
    TN = _pick_tile(Np, 256)
    k_steps = Kp // TK
    kernel = functools.partial(_matmul_kernel, act=act, k_steps=k_steps)
    pc = pl.pallas_call(
        kernel,
        out_shape=jax.ShapeDtypeStruct((Mp, Np), F32),
        grid=(Mp // TM, Np // TN, k_steps),
        in_specs=[
            pl.BlockSpec((TM, TK), lambda i, j, k: (i, k)),
            pl.BlockSpec((TK, TN), lambda i, j, k: (k, j)),
            pl.BlockSpec((1, TN), lambda i, j, k: (0, j)),
        ],
        out_specs=pl.BlockSpec((TM, TN), lambda i, j, k: (i, j)),
        scratch_shapes=[pltpu.VMEM((TM, TN), F32)],
        compiler_params=pltpu.CompilerParams(
            dimension_semantics=("parallel", "parallel", "arbitrary"),
            vmem_limit_bytes=_VMEM_LIMIT),
    )
    return jax.jit(pc)


def matmul(x, w, b=None, act="none", n_out=None):
    """y = x @ w[:K, :n_out] + b.  `w` is pre-padded to 128-multiples (Kp, Np)."""
    M, K = x.shape
    Kp, Np = w.shape
    assert K <= Kp
    if n_out is None:
        n_out = int(b.shape[0]) if b is not None else Np
    if M > 256:
        Mp = _round_up(M, 256)
    else:
        Mp = _round_up(max(M, 8), 8)
    xp = x if (Mp == M and Kp == K) else jnp.pad(x, ((0, Mp - M), (0, Kp - K)))
    if b is None:
        bp = jnp.zeros((1, Np), F32)
    else:
        bp = jnp.pad(b, (0, Np - n_out)).reshape(1, Np)
    out = _matmul_fn(Mp, Kp, Np, act)(xp, w, bp)
    return out[:M, :n_out]


# ----------------------------------------------------------------------------
# Direct 3x3 / stride-1 conv kernel (no im2col materialization in HBM)
# ----------------------------------------------------------------------------
def _conv3_kernel(x_ref, w_ref, b_ref, o_ref, *, H, W, kc_steps):
    kc = pl.program_id(2)

    @pl.when(kc == 0)
    def _():
        o_ref[...] = jnp.zeros_like(o_ref)

    for h in range(H):                      # per-output-row matmuls (no in-kernel reshapes)
        acc = None
        for t in range(9):
            dh, dw = divmod(t, 3)
            win = x_ref[0, h + dh, dw:dw + W, :]           # (W, TKC)
            d = jnp.dot(win, w_ref[t], preferred_element_type=jnp.float32)
            acc = d if acc is None else acc + d
        o_ref[0, h] = o_ref[0, h] + acc

    @pl.when(kc == kc_steps - 1)
    def _():
        o_ref[...] = o_ref[...] + b_ref[...]


@functools.lru_cache(maxsize=None)
def _conv3_fn(N, H, W, Cin_p, Coutp):
    TKC = _pick_tile(Cin_p, 512)
    TN = _pick_tile(Coutp, 256)
    kc_steps = Cin_p // TKC
    kernel = functools.partial(_conv3_kernel, H=H, W=W, kc_steps=kc_steps)
    pc = pl.pallas_call(
        kernel,
        out_shape=jax.ShapeDtypeStruct((N, H, W, Coutp), F32),
        grid=(N, Coutp // TN, kc_steps),
        in_specs=[
            pl.BlockSpec((1, H + 2, W + 2, TKC), lambda n, j, kc: (n, 0, 0, kc)),
            pl.BlockSpec((9, TKC, TN), lambda n, j, kc: (0, kc, j)),
            pl.BlockSpec((1, TN), lambda n, j, kc: (0, j)),
        ],
        out_specs=pl.BlockSpec((1, H, W, TN), lambda n, j, kc: (n, 0, 0, j)),
        compiler_params=pltpu.CompilerParams(
            dimension_semantics=("parallel", "parallel", "arbitrary"),
            vmem_limit_bytes=_VMEM_LIMIT),
    )
    return jax.jit(pc)


def conv3x3_s1(x, p):
    """3x3, stride 1, padding 1.  p['w']: (9, Cin_p, Coutp) per-tap matrices; p['b']: (Cout,)."""
    N, H, W, C = x.shape
    w, b = p['w'], p['b']
    Cin_p, Coutp = int(w.shape[1]), int(w.shape[2])
    Cout = int(b.shape[0])
    xp = jnp.pad(x, ((0, 0), (1, 1), (1, 1), (0, Cin_p - C)))
    bp = jnp.pad(b, (0, Coutp - Cout)).reshape(1, Coutp)
    y = _conv3_fn(N, H, W, Cin_p, Coutp)(xp, w, bp)
    return y[..., :Cout]


def conv3x3_s2(x, p):
    """3x3, stride 2, padding 1 (only the 3 downsample convs): subsampled im2col + matmul."""
    N, H, W, C = x.shape
    Ho, Wo = H // 2, W // 2
    xp = jnp.pad(x, ((0, 0), (1, 1), (1, 1), (0, 0)))
    cols = [xp[:, dh:dh + 2 * Ho:2, dw:dw + 2 * Wo:2, :] for dh in range(3) for dw in range(3)]
    patches = jnp.concatenate(cols, axis=-1).reshape(N * Ho * Wo, 9 * C)
    y = matmul(patches, p['w'], p['b'])
    return y.reshape(N, Ho, Wo, -1)


def conv1x1(x, p):
    N, H, W, C = x.shape
    y = matmul(x.reshape(N * H * W, C), p['w'], p['b'])
    return y.reshape(N, H, W, -1)


# ----------------------------------------------------------------------------
# GroupNorm (fused SiLU) and row-tiled LayerNorm, two-pass centered variance
# ----------------------------------------------------------------------------
def _groupnorm_kernel(x_ref, g_ref, gt_ref, gamma_ref, beta_ref, o_ref, *, eps, silu, count):
    x = x_ref[0]                                                   # (L, C)
    s = jnp.sum(x, axis=0, keepdims=True)                          # (1, C)
    gsum = jnp.dot(s, g_ref[...], preferred_element_type=jnp.float32)          # (1, G)
    mean_c = jnp.dot(gsum / count, gt_ref[...], preferred_element_type=jnp.float32)
    xc = x - mean_c
    sq = jnp.sum(xc * xc, axis=0, keepdims=True)
    gsq = jnp.dot(sq, g_ref[...], preferred_element_type=jnp.float32)
    rstd_c = jnp.dot(jax.lax.rsqrt(gsq / count + eps), gt_ref[...],
                     preferred_element_type=jnp.float32)
    y = xc * rstd_c * gamma_ref[...] + beta_ref[...]
    if silu:
        y = y * (1.0 / (1.0 + jnp.exp(-y)))
    o_ref[0] = y


@functools.lru_cache(maxsize=None)
def _groupnorm_fn(B, L, C, eps, silu, groups=32):
    cg = C // groups
    gmat = np.zeros((C, groups), np.float32)
    gmat[np.arange(C), np.arange(C) // cg] = 1.0
    g_j = jnp.asarray(gmat)
    gt_j = jnp.asarray(np.ascontiguousarray(gmat.T))
    kernel = functools.partial(_groupnorm_kernel, eps=eps, silu=silu, count=float(L * cg))
    pc = pl.pallas_call(
        kernel,
        out_shape=jax.ShapeDtypeStruct((B, L, C), F32),
        grid=(B,),
        in_specs=[
            pl.BlockSpec((1, L, C), lambda n: (n, 0, 0)),
            pl.BlockSpec((C, groups), lambda n: (0, 0)),
            pl.BlockSpec((groups, C), lambda n: (0, 0)),
            pl.BlockSpec((1, C), lambda n: (0, 0)),
            pl.BlockSpec((1, C), lambda n: (0, 0)),
        ],
        out_specs=pl.BlockSpec((1, L, C), lambda n: (n, 0, 0)),
        compiler_params=pltpu.CompilerParams(dimension_semantics=("parallel",),
                                             vmem_limit_bytes=_VMEM_LIMIT),
    )
    return jax.jit(lambda x, gamma, beta: pc(x, g_j, gt_j, gamma, beta))


def group_norm_nhwc(x, gamma, beta, eps, silu):
    N, H, W, C = x.shape
    y = _groupnorm_fn(N, H * W, C, float(eps), bool(silu))(
        x.reshape(N, H * W, C), gamma.reshape(1, C), beta.reshape(1, C))
    return y.reshape(N, H, W, C)


def _layernorm_kernel(x_ref, gamma_ref, beta_ref, o_ref, *, eps):
    x = x_ref[...]
    mean = jnp.mean(x, axis=1, keepdims=True)
    xc = x - mean
    var = jnp.mean(xc * xc, axis=1, keepdims=True)
    o_ref[...] = xc * jax.lax.rsqrt(var + eps) * gamma_ref[...] + beta_ref[...]


@functools.lru_cache(maxsize=None)
def _layernorm_fn(Mp, C, eps, TM):
    kernel = functools.partial(_layernorm_kernel, eps=eps)
    pc = pl.pallas_call(
        kernel,
        out_shape=jax.ShapeDtypeStruct((Mp, C), F32),
        grid=(Mp // TM,),
        in_specs=[
            pl.BlockSpec((TM, C), lambda i: (i, 0)),
            pl.BlockSpec((1, C), lambda i: (0, 0)),
            pl.BlockSpec((1, C), lambda i: (0, 0)),
        ],
        out_specs=pl.BlockSpec((TM, C), lambda i: (i, 0)),
        compiler_params=pltpu.CompilerParams(dimension_semantics=("parallel",),
                                             vmem_limit_bytes=_VMEM_LIMIT),
    )
    return jax.jit(pc)


def layer_norm(x2d, gamma, beta, eps=1e-5):
    M, C = x2d.shape
    if M > 256:
        Mp, TM = _round_up(M, 256), 256
    else:
        Mp = _round_up(max(M, 8), 8)
        TM = Mp
    xp = x2d if Mp == M else jnp.pad(x2d, ((0, Mp - M), (0, 0)))
    y = _layernorm_fn(Mp, C, float(eps), TM)(xp, gamma.reshape(1, C), beta.reshape(1, C))
    return y[:M]


# ----------------------------------------------------------------------------
# Attention: all heads of one image per grid step, head dim padded to 128 multiple
# ----------------------------------------------------------------------------
def _attention_kernel(q_ref, k_ref, v_ref, o_ref, *, scale):
    q = q_ref[...] * scale                                         # (G, S, Dp) - scale on O(S*D)
    k = k_ref[...]                                                 # (G, L, Dp)
    v = v_ref[...]
    s = jnp.einsum('gsd,gtd->gst', q, k, preferred_element_type=jnp.float32)    # (G, S, L)
    m = jnp.max(s, axis=-1, keepdims=True)
    p = jnp.exp(s - m)
    denom = jnp.sum(p, axis=-1, keepdims=True)
    p = p * pl.reciprocal(denom, approx=True)                      # EUP, no full-precision divide
    o_ref[...] = jnp.einsum('gst,gtd->gsd', p, v, preferred_element_type=jnp.float32)


@functools.lru_cache(maxsize=None)
def _attention_fn(N, n_head, S, L, Dp, d):
    kernel = functools.partial(_attention_kernel, scale=1.0 / math.sqrt(d))
    pc = pl.pallas_call(
        kernel,
        out_shape=jax.ShapeDtypeStruct((N * n_head, S, Dp), F32),
        grid=(N,),
        in_specs=[
            pl.BlockSpec((n_head, S, Dp), lambda n: (n, 0, 0)),
            pl.BlockSpec((n_head, L, Dp), lambda n: (n, 0, 0)),
            pl.BlockSpec((n_head, L, Dp), lambda n: (n, 0, 0)),
        ],
        out_specs=pl.BlockSpec((n_head, S, Dp), lambda n: (n, 0, 0)),
        compiler_params=pltpu.CompilerParams(dimension_semantics=("parallel",),
                                             vmem_limit_bytes=_VMEM_LIMIT),
    )
    return jax.jit(pc)


def _split_heads(t, N, S, n_head, d, dp):
    t = t.reshape(N, S, n_head, d).transpose(0, 2, 1, 3).reshape(N * n_head, S, d)
    if dp != d:
        t = jnp.pad(t, ((0, 0), (0, 0), (0, dp - d)))
    return t


def _merge_heads(t, N, S, n_head, d):
    return t[..., :d].reshape(N, n_head, S, d).transpose(0, 2, 1, 3).reshape(N * S, n_head * d)


def self_attention(x, p, n_head):
    N, S, C = x.shape
    d = C // n_head
    dp = _rnd128(d)
    qkv = matmul(x.reshape(N * S, C), p['in_w'], n_out=3 * C)      # in_proj_bias=False
    q = _split_heads(qkv[:, :C], N, S, n_head, d, dp)
    k = _split_heads(qkv[:, C:2 * C], N, S, n_head, d, dp)
    v = _split_heads(qkv[:, 2 * C:3 * C], N, S, n_head, d, dp)
    o = _attention_fn(N, n_head, S, S, dp, d)(q, k, v)
    o = matmul(_merge_heads(o, N, S, n_head, d), p['out_w'], p['out_b'])
    return o.reshape(N, S, C)


def cross_attention(x, context, p, n_head):
    N, S, C = x.shape
    _, L, Dc = context.shape
    d = C // n_head
    dp = _rnd128(d)
    q = _split_heads(matmul(x.reshape(N * S, C), p['q_w'], n_out=C), N, S, n_head, d, dp)
    k = _split_heads(matmul(context.reshape(N * L, Dc), p['k_w'], n_out=C), N, L, n_head, d, dp)
    v = _split_heads(matmul(context.reshape(N * L, Dc), p['v_w'], n_out=C), N, L, n_head, d, dp)
    o = _attention_fn(N, n_head, S, L, dp, d)(q, k, v)
    o = matmul(_merge_heads(o, N, S, n_head, d), p['out_w'], p['out_b'])
    return o.reshape(N, S, C)


# ----------------------------------------------------------------------------
# Blocks
# ----------------------------------------------------------------------------
def residual_block(x, time_emb, p):
    residue = x
    h = group_norm_nhwc(x, p['gn_f']['gamma'], p['gn_f']['beta'], 1e-5, silu=True)
    h = conv3x3_s1(h, p['conv_f'])
    t = time_emb * jax.nn.sigmoid(time_emb)                        # F.silu(time) - tiny glue
    t = matmul(t, p['lin_t']['w'], p['lin_t']['b'])
    h = h + t[:, None, None, :]
    h = group_norm_nhwc(h, p['gn_m']['gamma'], p['gn_m']['beta'], 1e-5, silu=True)
    h = conv3x3_s1(h, p['conv_m'])
    res = residue if p['res'] is None else conv1x1(residue, p['res'])
    return h + res


def attention_block(x, context, p):
    n_head = p['n_head']
    N, H, W, C = x.shape
    S = H * W
    residue_long = x
    h = group_norm_nhwc(x, p['gn']['gamma'], p['gn']['beta'], 1e-6, silu=False)
    h = conv1x1(h, p['conv_in'])
    h = h.reshape(N, S, C)                                         # == NCHW view + transpose(-1,-2)

    hn = layer_norm(h.reshape(N * S, C), p['ln1']['gamma'], p['ln1']['beta']).reshape(N, S, C)
    h = h + self_attention(hn, p['attn1'], n_head)

    hn = layer_norm(h.reshape(N * S, C), p['ln2']['gamma'], p['ln2']['beta']).reshape(N, S, C)
    h = h + cross_attention(hn, context, p['attn2'], n_head)

    hn = layer_norm(h.reshape(N * S, C), p['ln3']['gamma'], p['ln3']['beta'])
    a = matmul(hn, p['geglu1_a']['w'], p['geglu1_a']['b'])
    g = matmul(hn, p['geglu1_g']['w'], p['geglu1_g']['b'])
    hn = a * jax.nn.gelu(g, approximate=False)                     # exact (erf) GELU gating
    hn = matmul(hn, p['geglu2']['w'], p['geglu2']['b'])
    h = h + hn.reshape(N, S, C)

    h = h.reshape(N, H, W, C)
    return conv1x1(h, p['conv_out']) + residue_long


def run_sequential(layers, x, context, time_emb):
    for item in layers:
        kind, p = item[0], item[1]
        if kind == 'conv3s1':
            x = conv3x3_s1(x, p)
        elif kind == 'conv3s2':
            x = conv3x3_s2(x, p)
        elif kind == 'res':
            x = residual_block(x, time_emb, p)
        elif kind == 'attn':
            x = attention_block(x, context, p)
        elif kind == 'up':                                         # Upsample: nearest 2x + conv3x3
            x = jnp.repeat(jnp.repeat(x, 2, axis=1), 2, axis=2)
            x = conv3x3_s1(x, p)
    return x


def diffusion_forward(params, latent_nchw, context, time):
    # TimeEmbedding: Linear(320,1280) -> SiLU -> Linear(1280,1280)
    t = matmul(time, params['time']['lin1']['w'], params['time']['lin1']['b'], act="silu")
    t = matmul(t, params['time']['lin2']['w'], params['time']['lin2']['b'])
    # UNET (NCHW -> NHWC internally)
    x = jnp.transpose(latent_nchw, (0, 2, 3, 1))
    skips = []
    for layers in params['enc']:
        x = run_sequential(layers, x, context, t)
        skips.append(x)
    x = run_sequential(params['bottleneck'], x, context, t)
    for layers in params['dec']:
        # TODO(synk): split the first conv over x/skip halves to avoid this HBM concat copy.
        x = jnp.concatenate([x, skips.pop()], axis=-1)             # torch.cat(dim=1)
        x = run_sequential(layers, x, context, t)
    # UNET_OutputLayer: GroupNorm(32,320) -> SiLU -> Conv3x3(320,4)
    x = group_norm_nhwc(x, params['final_gn']['gamma'], params['final_gn']['beta'], 1e-5, silu=True)
    x = conv3x3_s1(x, params['final_conv'])
    return jnp.transpose(x, (0, 3, 1, 2))                          # back to NCHW


# ----------------------------------------------------------------------------
# Deterministic synthetic parameters (shapes match the PyTorch module), pre-padded
# ----------------------------------------------------------------------------
_rng = np.random.default_rng(0)


def _randn(shape, scale=0.02):
    return (_rng.standard_normal(shape, dtype=np.float32) * scale).astype(np.float32)


def _pad_np(a, shape):
    out = np.zeros(shape, np.float32)
    out[tuple(slice(0, s) for s in a.shape)] = a
    return out


def proj_weight(din, dout):
    return jnp.asarray(_pad_np(_randn((din, dout)), (_rnd128(din), _rnd128(dout))))


def linear_params(din, dout, bias=True):
    return {'w': proj_weight(din, dout),
            'b': jnp.asarray(_randn((dout,))) if bias else None}


def conv1_params(cin, cout):
    return linear_params(cin, cout, bias=True)


def conv3_params(cin, cout):                                       # stride-1 direct-conv layout
    w = _pad_np(_randn((9, cin, cout)), (9, _rnd128(cin), _rnd128(cout)))
    return {'w': jnp.asarray(w), 'b': jnp.asarray(_randn((cout,)))}


def conv3s2_params(cin, cout):                                     # stride-2 im2col/matmul layout
    w = _pad_np(_randn((9 * cin, cout)), (_rnd128(9 * cin), _rnd128(cout)))
    return {'w': jnp.asarray(w), 'b': jnp.asarray(_randn((cout,)))}


def norm_params(c):
    return {'gamma': jnp.asarray((1.0 + 0.01 * _rng.standard_normal(c)).astype(np.float32)),
            'beta': jnp.asarray((0.01 * _rng.standard_normal(c)).astype(np.float32))}


def resblock_params(cin, cout, n_time=1280):
    return {'gn_f': norm_params(cin), 'conv_f': conv3_params(cin, cout),
            'lin_t': linear_params(n_time, cout),
            'gn_m': norm_params(cout), 'conv_m': conv3_params(cout, cout),
            'res': None if cin == cout else conv1_params(cin, cout)}


def attnblock_params(n_head, n_embd, d_context=768):
    c = n_head * n_embd
    return {'n_head': n_head,
            'gn': norm_params(c),
            'conv_in': conv1_params(c, c),
            'ln1': norm_params(c),
            'attn1': {'in_w': proj_weight(c, 3 * c),
                      'out_w': proj_weight(c, c), 'out_b': jnp.asarray(_randn((c,)))},
            'ln2': norm_params(c),
            'attn2': {'q_w': proj_weight(c, c), 'k_w': proj_weight(d_context, c),
                      'v_w': proj_weight(d_context, c),
                      'out_w': proj_weight(c, c), 'out_b': jnp.asarray(_randn((c,)))},
            'ln3': norm_params(c),
            'geglu1_a': linear_params(c, 4 * c), 'geglu1_g': linear_params(c, 4 * c),
            'geglu2': linear_params(4 * c, c),
            'conv_out': conv1_params(c, c)}


def build_diffusion_params():
    enc = [
        [('conv3s1', conv3_params(4, 320))],
        [('res', resblock_params(320, 320)), ('attn', attnblock_params(8, 40))],
        [('res', resblock_params(320, 320)), ('attn', attnblock_params(8, 40))],
        [('conv3s2', conv3s2_params(320, 320))],
        [('res', resblock_params(320, 640)), ('attn', attnblock_params(8, 80))],
        [('res', resblock_params(640, 640)), ('attn', attnblock_params(8, 80))],
        [('conv3s2', conv3s2_params(640, 640))],
        [('res', resblock_params(640, 1280)), ('attn', attnblock_params(8, 160))],
        [('res', resblock_params(1280, 1280)), ('attn', attnblock_params(8, 160))],
        [('conv3s2', conv3s2_params(1280, 1280))],
        [('res', resblock_params(1280, 1280))],
        [('res', resblock_params(1280, 1280))],
    ]
    bottleneck = [('res', resblock_params(1280, 1280)),
                  ('attn', attnblock_params(8, 160)),
                  ('res', resblock_params(1280, 1280))]
    dec = [
        [('res', resblock_params(2560, 1280))],
        [('res', resblock_params(2560, 1280))],
        [('res', resblock_params(2560, 1280)), ('up', conv3_params(1280, 1280))],
        [('res', resblock_params(2560, 1280)), ('attn', attnblock_params(8, 160))],
        [('res', resblock_params(2560, 1280)), ('attn', attnblock_params(8, 160))],
        [('res', resblock_params(1920, 1280)), ('attn', attnblock_params(8, 160)),
         ('up', conv3_params(1280, 1280))],
        [('res', resblock_params(1920, 640)), ('attn', attnblock_params(8, 80))],
        [('res', resblock_params(1280, 640)), ('attn', attnblock_params(8, 80))],
        [('res', resblock_params(960, 640)), ('attn', attnblock_params(8, 80)),
         ('up', conv3_params(640, 640))],
        [('res', resblock_params(960, 320)), ('attn', attnblock_params(8, 40))],
        [('res', resblock_params(640, 320)), ('attn', attnblock_params(8, 40))],
        [('res', resblock_params(640, 320)), ('attn', attnblock_params(8, 40))],
    ]
    return {'time': {'lin1': linear_params(320, 1280), 'lin2': linear_params(1280, 1280)},
            'enc': enc, 'bottleneck': bottleneck, 'dec': dec,
            'final_gn': norm_params(320), 'final_conv': conv3_params(320, 4)}


# ----------------------------------------------------------------------------
if __name__ == "__main__":
    params = build_diffusion_params()

    key = jax.random.PRNGKey(0)
    k1, k2, k3 = jax.random.split(key, 3)
    latent = jax.random.normal(k1, (1, 4, 8, 8), dtype=F32)        # NCHW latent
    context = jax.random.normal(k2, (1, 8, 768), dtype=F32)        # (batch, seq, d_context)
    time = jax.random.normal(k3, (1, 320), dtype=F32)              # (1, n_embd=320)

    out = diffusion_forward(params, latent, context, time)
    out = jax.block_until_ready(out)
    assert out.shape == (1, 4, 8, 8), out.shape
    assert bool(jnp.all(jnp.isfinite(out)))
    print("KERNEL_OK")
</pallas_src>

<mosaic_0001>
module attributes {stable_mosaic.version = 11 : i64} {
  func.func @_matmul_kernel(%arg0: i32, %arg1: i32, %arg2: i32, %arg3: memref<8x384xf32, #tpu.memory_space<vmem>>, %arg4: memref<384x256xf32, #tpu.memory_space<vmem>>, %arg5: memref<1x256xf32, #tpu.memory_space<vmem>>, %arg6: memref<8x256xf32, #tpu.memory_space<vmem>>, %arg7: memref<8x256xf32, #tpu.memory_space<vmem>>) attributes {dimension_semantics = [#tpu.dimension_semantics<parallel>, #tpu.dimension_semantics<parallel>, #tpu.dimension_semantics<arbitrary>], iteration_bounds = array<i64: 1, 5, 1>, scalar_prefetch = 0 : i64, scratch_operands = 1 : i64, tpu.core_type = #tpu.core_type<tc>, window_params = [{transform_indices = @transform_0, window_bounds = array<i64: 8, 384>}, {transform_indices = @transform_1, window_bounds = array<i64: 384, 256>}, {transform_indices = @transform_2, window_bounds = array<i64: 1, 256>}, {transform_indices = @transform_3, window_bounds = array<i64: 8, 256>}]} {
    %c0_i32 = arith.constant 0 : i32
    %0 = arith.cmpi eq, %arg2, %c0_i32 : i32
    %1 = arith.extui %0 : i1 to i32
    %c0_i32_0 = arith.constant 0 : i32
    %2 = arith.cmpi ne, %1, %c0_i32_0 : i32
    scf.if %2 {
      %cst_10 = arith.constant 0.000000e+00 : f32
      %12 = vector.broadcast %cst_10 : f32 to vector<8x256xf32>
      %c0_11 = arith.constant 0 : index
      %c0_12 = arith.constant 0 : index
      %13 = vector.load %arg7[%c0_11, %c0_12] : memref<8x256xf32, #tpu.memory_space<vmem>>, vector<8x256xf32>
      tpu.vector_store %arg7[%c0_11, %c0_12], %12 {strides = array<i32>} : memref<8x256xf32, #tpu.memory_space<vmem>>, vector<8x256xf32>,
    } else {
    }
    %c0 = arith.constant 0 : index
    %c0_1 = arith.constant 0 : index
    %3 = vector.load %arg7[%c0, %c0_1] : memref<8x256xf32, #tpu.memory_space<vmem>>, vector<8x256xf32>
    %c0_2 = arith.constant 0 : index
    %c0_3 = arith.constant 0 : index
    %4 = vector.load %arg3[%c0_2, %c0_3] : memref<8x384xf32, #tpu.memory_space<vmem>>, vector<8x384xf32>
    %c0_4 = arith.constant 0 : index
    %c0_5 = arith.constant 0 : index
    %5 = vector.load %arg4[%c0_4, %c0_5] : memref<384x256xf32, #tpu.memory_space<vmem>>, vector<384x256xf32>
    %cst = arith.constant dense<0.000000e+00> : vector<8x256xf32>
    %6 = tpu.matmul %4, %5, %cst {dimension_numbers = #tpu.dot_dimension_numbers<[1], [0], [0], [1], [0, 0, 1, 1], [], []>} : vector<8x384xf32>, vector<384x256xf32>, vector<8x256xf32> -> vector<8x256xf32>
    %7 = arith.addf %3, %6 : vector<8x256xf32>
    %c0_6 = arith.constant 0 : index
    %c0_7 = arith.constant 0 : index
    %8 = vector.load %arg7[%c0_6, %c0_7] : memref<8x256xf32, #tpu.memory_space<vmem>>, vector<8x256xf32>
    tpu.vector_store %arg7[%c0_6, %c0_7], %7 {strides = array<i32>} : memref<8x256xf32, #tpu.memory_space<vmem>>, vector<8x256xf32>,
    %c0_i32_8 = arith.constant 0 : i32
    %9 = arith.cmpi eq, %arg2, %c0_i32_8 : i32
    %10 = arith.extui %9 : i1 to i32
    %c0_i32_9 = arith.constant 0 : i32
    %11 = arith.cmpi ne, %10, %c0_i32_9 : i32
    scf.if %11 {
      %c0_10 = arith.constant 0 : index
      %c0_11 = arith.constant 0 : index
      %12 = vector.load %arg7[%c0_10, %c0_11] : memref<8x256xf32, #tpu.memory_space<vmem>>, vector<8x256xf32>
      %c0_12 = arith.constant 0 : index
      %c0_13 = arith.constant 0 : index
      %13 = vector.load %arg5[%c0_12, %c0_13] : memref<1x256xf32, #tpu.memory_space<vmem>>, vector<1x256xf32>
      %14 = vector.broadcast %13 : vector<1x256xf32> to vector<8x256xf32>
      %15 = arith.addf %12, %14 : vector<8x256xf32>
      %cst_14 = arith.constant 0.000000e+00 : f32
      %16 = vector.broadcast %cst_14 : f32 to vector<8x256xf32>
      %17 = arith.subf %16, %15 : vector<8x256xf32>
      %18 = math.exp %17 : vector<8x256xf32>
      %cst_15 = arith.constant 1.000000e+00 : f32
      %19 = vector.broadcast %cst_15 : f32 to vector<8x256xf32>
      %20 = arith.addf %19, %18 : vector<8x256xf32>
      %cst_16 = arith.constant 1.000000e+00 : f32
      %21 = vector.broadcast %cst_16 : f32 to vector<8x256xf32>
      %22 = arith.divf %21, %20 : vector<8x256xf32>
      %23 = arith.mulf %15, %22 : vector<8x256xf32>
      %c0_17 = arith.constant 0 : index
      %c0_18 = arith.constant 0 : index
      %24 = vector.load %arg6[%c0_17, %c0_18] : memref<8x256xf32, #tpu.memory_space<vmem>>, vector<8x256xf32>
      tpu.vector_store %arg6[%c0_17, %c0_18], %23 {strides = array<i32>} : memref<8x256xf32, #tpu.memory_space<vmem>>, vector<8x256xf32>,
    } else {
    }
    return
  }
  func.func @transform_0(%arg0: i32, %arg1: i32, %arg2: i32) -> (i32, i32) {
    %c0_i32 = arith.constant 0 : i32
    return %arg0, %arg2 : i32, i32
  }
  func.func @transform_1(%arg0: i32, %arg1: i32, %arg2: i32) -> (i32, i32) {
    %c0_i32 = arith.constant 0 : i32
    return %arg2, %arg1 : i32, i32
  }
  func.func @transform_2(%arg0: i32, %arg1: i32, %arg2: i32) -> (i32, i32) {
    %c0_i32 = arith.constant 0 : i32
    %c0_i32_0 = arith.constant 0 : i32
    return %c0_i32, %arg1 : i32, i32
  }
  func.func @transform_3(%arg0: i32, %arg1: i32, %arg2: i32) -> (i32, i32) {
    %c0_i32 = arith.constant 0 : i32
    return %arg0, %arg1 : i32, i32
  }
}

</mosaic_0001>

<bundles_post_ra>
// kernel: tpu_custom_call.1
= control target key start
LH: loop header
LB: loop body
LE: loop exit
PB: predicated region body
PF: predicated region fallthrough
CT: control target
= control target key end

     0   :  { %s1472_s0 = inlined_call_operand.hbm [shape: f32[8,384], index: 0, kind: input, shape index: {}]   ;;  %s1473_s1 = inlined_call_operand.hbm [shape: f32[384,1280], index: 1, kind: input, shape index: {}]   ;;  %s1474_s2 = inlined_call_operand.hbm [shape: f32[1,1280], index: 2, kind: input, shape index: {}]   ;;  %s1475_s3 = inlined_call_operand.hbm [shape: f32[8,1280], index: 3, kind: output, shape index: {}]  }
   0x1   :  { %1481 = sst [smem:[#allocation13_spill]] %s1473_s1 }
   0x2   :  { %8 = vsyncpa [#allocation4], 0 }
   0x3   :  { %9 = vsyncpa [#allocation7], 0 }
   0x4   :  { %11 = vsyncpa [#allocation7 + $0x1], 0 }
   0x5   :  { %12 = vsyncpa [#allocation5], 0 }
   0x6   :  { %14 = vsyncpa [#allocation5 + $0x1], 0  ;;  %s1125_s12 = smov 0   ;;  %s1127_s13 = smov 0  }
   0x7   :  { %s1129_s14 = smov 0   ;;  %s1131_s15 = smov 0  }
   0x8   :  { %s1133_s16 = smov 0   ;;  %s1135_s17 = smov 0  }
   0x9 LB: > { %s35_s18 = sadd.s32 1, %s1091_s16  ;;  %s76_s19 = sadd.s32 1, %s1083_s14  ;;  %s1095_s17 = sphi %s1135_s17, %s20_s17   ;;  %s1091_s16 = sphi %s1133_s16, %s1500_s16   ;;  %s1087_s15 = sphi %s1131_s15, %s1499_s15   ;;  %s1083_s14 = sphi %s1129_s14, %s1498_s14   ;;  %s1079_s13 = sphi %s1127_s13, %s1497_s13   ;;  %s1075_s12 = sphi %s1125_s12, %s1496_s12  }
   0xa   : > { %p37_p0 = scmp.ge.s32.totalorder %s35_s18, 5  ;;  %p83_p1 = scmp.ne.s32.totalorder %s1083_s14, %s1079_s13 }
   0xb   : > { %p84_p2 = scmp.eq.s32.totalorder %s1095_s17, 0  ;;  %p857_p4 = scmp.lt.s32.totalorder %s1095_s17, 5 }
   0xc   : > { %s1502_s18 = smov (%p37_p0, %s35_s18), 0  ;;  %s183_s21 = sand.u32 1, %s1095_s17  }
   0xd   : > { %p85_p3 = por %p84_p2, %p83_p1  ;;  %s72_s20 = ssub.s32 %s1091_s16, %s1502_s18 }
   0xe   : > { %p74_p5 = scmp.eq.s32.totalorder %s72_s20, 0  ;;  %s185_s22 = sand.u32 1, %s1083_s14  }
   0xf   : > { %s728_s23 = sshll.u32 %s1091_s16, 8  ;;  %s829_s25 = smul.u32 768, %s185_s22 }
  0x10   : > { %s1172_s24 = scalar_select %p74_p5, %s1083_s14, %s76_s19  }
  0x11   : > { %s1482_s1 = sld [smem:[#allocation13_spill]]  ;;  %p1181_p6 = pnand %p857_p4, %p85_p3 }
  0x12   : > { %s187_s30 = scalar_lea.vmem [#allocation6], %s829_s25  ;;  %s1187_s5 = scalar_lea.sflag [#allocation7], %s183_s21 }
  0x13   : > { %s197_s4 = sshll.u32 %s187_s30, 4  ;;  %p923_p8 = pneg %p1181_p6  ;;  %s1185_s4 = int_to_ptr.vmem [resolvable:$true] %s197_s4 }
  0x17   : > { %s1179_s28 = scalar_lea.hbm %s1482_s1, %s728_s23  ;;  %s926_s9 = scalar_lea.hbm %s1482_s1, 61440 }
  0x18   : > { %s921_s6 = scalar_lea.hbm %s1179_s28, 12288  ;;  %p927_p11 = scmp.lt.u32.totalorder %s1179_s28, %s1482_s1 }
  0x19   : > { %p922_p7 = scmp.ne.s32.totalorder %s1179_s28, %s921_s6  ;;  %p928_p12 = scmp.lt.u32.totalorder %s926_s9, %s921_s6 }
  0x1a   : > { %p930_p0 = scmp.lt.u32.totalorder %s921_s6, %s1179_s28 }
  0x1b   : > { %p924_p9 = pnand %p923_p8, %p922_p7  ;;  %p929_p13 = por %p928_p12, %p927_p11 }
  0x1d   : > { %p925_p10 = pneg %p924_p9  ;;  %p931_p2 = por %p930_p0, %p929_p13 }
  0x1f   : > { %p932_p3 = pnand %p931_p2, %p925_p10 }
  0x21   : > { %935 = shalt.err (!%p932_p3)
}
  0x22   : > { %s936_s19 = scalar_lea.vmem %s1185_s4, 12288  ;;  %s1097_s20 = smov [#allocation6]  }
  0x23   : > { %p937_p4 = scmp.ne.s32.totalorder %s1185_s4, %s936_s19  ;;  %s941_s21 = sshll.u32 %s1097_s20, 4  ;;  %s942_s21 = int_to_ptr.vmem [resolvable:$false] %s941_s21 }
  0x24   : > { %s943_s23 = scalar_lea.vmem %s942_s21, 24576  ;;  %p944_p9 = scmp.lt.s32.totalorder %s1185_s4, %s942_s21 }
  0x25   : > { %p939_p5 = pnand %p937_p4, %p923_p8  ;;  %p945_p11 = scmp.lt.s32.totalorder %s943_s23, %s936_s19 }
  0x27   : > { %p940_p7 = pneg %p939_p5  ;;  %p946_p12 = por %p945_p11, %p944_p9 }
  0x29   : > { %p947_p13 = pnand %p946_p12, %p940_p7 }
  0x2b   : > { %950 = shalt.err (!%p947_p13)
}
  0x2c   : > { %s1098_s25 = smov 1280   ;;  %s1099_s26 = smov 256  }
  0x2d   : > { %s1100_s27 = smov 16   ;;  %s1216_s30 = sadd.s32 4294967295, %s1095_s17  }
  0x2e   : > { %848 = dma.hbm_to_vmem [thread:$0]  (!%p1181_p6), %s1179_s28, 12288, %s1185_s4, %s1187_s5, %s1098_s25, %s1099_s26, %s1100_s27  }
  0x2f   : > { %s710_s6 = sadd.s32 4294967294, %s1095_s17   ;;  %p89_p10 = scmp.ne.s32.totalorder %s1079_s13, %s1075_s12 }
  0x30   : > { %p1476_p0 = scmp.eq.s32.totalorder %s1216_s30, 0  ;;  %p141_p2 = scmp.eq.s32.totalorder %s1216_s30, 4 }
  0x31   : > { %p147_p3 = scmp.eq.s32.totalorder %s710_s6, 4  ;;  %p711_p5 = scmp.ge.s32.totalorder %s1095_s17, 1 }
  0x32   : > { %p1225_p4 = por %p1476_p0, %p89_p10  ;;  %p1233_p7 = por %p141_p2, %p83_p1 }
  0x33   : > { %p1237_p9 = por %p147_p3, %p89_p10  ;;  %p154_p11 = scmp.lt.s32.totalorder %s1095_s17, 6 }
  0x34   : > { %s1484_s7 = scalar_select %p1225_p4, 1, 0 }
  0x35   : > { %s1485_s28 = scalar_select %p1233_p7, 1, 0 }
  0x36   : > { %s1486_s4 = scalar_select %p1237_p9, 1, 0 }
  0x37   : > { %s716_s8 = sshll.u32 %s185_s22, 1  ;;  %p1244_p12 = pnand %p711_p5, %p154_p11 }
  0x38   : > { %s1101_s10 = smov [#allocation3]   ;;  %s729_s19 = sshll.u32 %s1091_s16, 5 }
  0x39   : > { %s1487_s9 = scalar_select %p1244_p12, 1, 0 }
  0x3a   : > { %s172_s11 = sshll.u32 %s1101_s10, 4  ;;  %p841_p1 = pneg %p1244_p12  ;;  %s1248_s11 = int_to_ptr.vmem [resolvable:$true] %s172_s11 }
  0x3b   : > { %s1256_s23 = scalar_lea.hbm %s1474_s2, %s729_s19  ;;  %s211_s22 = scalar_lea.vmem [#allocation8], %s716_s8 }
  0x3c   : > { %s219_s25 = sshll.u32 %s211_s22, 4  ;;  %p1260_p13 = pnand %p841_p1, %p1476_p0  ;;  %s220_s25 = int_to_ptr.vmem [resolvable:$true] %s219_s25 }
  0x3d   : > { %s951_s27 = scalar_lea.hbm %s1256_s23, 32  ;;  %s956_s19 = scalar_lea.hbm %s1474_s2, 160 }
  0x3e   : > { %s1488_s26 = scalar_select %p1260_p13, 1, 0 }
  0x3f   : > { %p952_p10 = scmp.ne.s32.totalorder %s1256_s23, %s951_s27  ;;  %p957_p5 = scmp.lt.u32.totalorder %s1256_s23, %s1474_s2 }
  0x40   : > { %p958_p11 = scmp.lt.u32.totalorder %s956_s19, %s951_s27  ;;  %p960_p0 = scmp.lt.u32.totalorder %s951_s27, %s1256_s23 }
  0x41   : > { %p954_p2 = pnand %p952_p10, %p923_p8 }
  0x42   : > { %p959_p1 = por %p958_p11, %p957_p5 }
  0x43   : > { %p955_p3 = pneg %p954_p2 }
  0x44   : > { %p961_p9 = por %p960_p0, %p959_p1 }
  0x46   : > { %p962_p7 = pnand %p961_p9, %p955_p3 }
  0x48   : > { %965 = shalt.err (!%p962_p7)
}
  0x49   : > { %s966_s8 = scalar_lea.vmem %s220_s25, 32  ;;  %s1102_s22 = smov [#allocation8]  }
  0x4a   : > { %p967_p4 = scmp.ne.s32.totalorder %s220_s25, %s966_s8  ;;  %s971_s6 = sshll.u32 %s1102_s22, 4  ;;  %s972_s6 = int_to_ptr.vmem [resolvable:$false] %s971_s6 }
  0x4b   : > { %s973_s10 = scalar_lea.vmem %s972_s6, 64  ;;  %p974_p12 = scmp.lt.s32.totalorder %s220_s25, %s972_s6 }
  0x4c   : > { %p969_p10 = pnand %p967_p4, %p923_p8  ;;  %p975_p13 = scmp.lt.s32.totalorder %s973_s10, %s966_s8 }
  0x4e   : > { %p970_p2 = pneg %p969_p10  ;;  %p976_p5 = por %p975_p13, %p974_p12 }
  0x50   : > { %p977_p11 = pnand %p976_p5, %p970_p2 }
  0x52   : > { %980 = shalt.err (!%p977_p11)
}
  0x53   : > { %851 = dma.hbm_to_vmem [thread:$0]  (!%p1181_p6), %s1256_s23, 32, %s220_s25, %s1187_s5  }
  0x54   : > { %s981_s20 = scalar_lea.hbm %s1472_s0, 384  ;;  %p1489_p0 = scmp.ne.s32.totalorder %s1488_s26, 0 }
  0x55   : > { %p982_p8 = scmp.ne.s32.totalorder %s1472_s0, %s981_s20  ;;  %p988_p12 = scmp.lt.u32.totalorder %s981_s20, %s1472_s0 }
  0x56   : > { %p983_p4 = pneg %p1489_p0 }
  0x58   : > { %p984_p7 = pnand %p983_p4, %p982_p8 }
  0x5a   : > { %p985_p9 = pneg %p984_p7 }
  0x5c   : > { %p990_p13 = pnand %p988_p12, %p985_p9 }
  0x5e   : > { %993 = shalt.err (!%p990_p13)
}
  0x5f   : > { %s994_s29 = scalar_lea.vmem %s1248_s11, 384  ;;  %p1002_p10 = scmp.lt.s32.totalorder %s1248_s11, %s1248_s11 }
  0x60   : > { %p995_p6 = scmp.ne.s32.totalorder %s1248_s11, %s994_s29  ;;  %p1003_p2 = scmp.lt.s32.totalorder %s994_s29, %s994_s29 }
  0x62   : > { %p997_p3 = pnand %p995_p6, %p983_p4  ;;  %p1004_p5 = por %p1003_p2, %p1002_p10 }
  0x64   : > { %p998_p1 = pneg %p997_p3 }
  0x66   : > { %p1005_p11 = pnand %p1004_p5, %p998_p1 }
  0x68   : > { %1008 = shalt.err (!%p1005_p11)
}
  0x69   : > { %844 = dma.hbm_to_vmem [thread:$0]  (!%p1489_p0), %s1472_s0, 384, %s1248_s11, [#allocation4]  }
  0x6a   : > { %p1490_p8 = scmp.ne.s32.totalorder %s1487_s9, 0 }
  0x6b   : > { %p1491_p7 = scmp.eq.s32.totalorder (!%p1490_p8), %s1216_s30, 0 }
  0x6c   : > { %228 = sbr.rel (%p1490_p8) target bundleno = 449 (0x1c1), region = 32 }
  0x73   : > { %1062 = dma.done.wait (%p1491_p7), [#allocation4], 384   ;;  %p1492_p4 = pmov %p1491_p7 }
  0x74   : > { %s234_s23 = sand.u32 1, %s1216_s30   ;;  %s1313_s25 = sand.u32 1, %s1079_s13  }
  0x75   : > { %1064 = vsyncadd (%p1492_p4), [#allocation4], 4294966912  ;;  %s830_s26 = smul.u32 768, %s1313_s25  ;;  %s235_s6 = scalar_lea.sflag [#allocation7], %s234_s23 }
  0x76   : > { %p1493_p0 = scmp.ne.s32.totalorder %s1484_s7, 0 }
  0x77   : > { %s1316_s10 = scalar_lea.vmem [#allocation6], %s830_s26 }
  0x78   : > { %1066 = dma.done.wait (%p1493_p0), %s235_s6, 12320  }
  0x79   : > { %1068 = vsyncadd (%p1493_p0), %s235_s6, 4294954976  ;;  %v1103_v0 = vmov 0.0   ;;  %v292_v1 = vld [vmem:[%s1316_s10 + $0x8] sm:$0xff]  ;;  %v294_v2 = vld [vmem:[%s1316_s10 + $0x18] sm:$0xff]  ;;  %s721_s30 = sshll.u32 %s1313_s25, 1  ;;  %s722_s9 = sshll.u32 %s1313_s25, 4 }
  0x7a   : > { %522 = vmatprep.mubr.f32.mxu0 %v1103_v0  ;;  %v291_v3 = vld [vmem:[%s1316_s10] sm:$0xff]  ;;  %v731_v4 = vpack.c.bf16 %v294_v2, %v292_v1  ;;  %v293_v5 = vld [vmem:[%s1316_s10 + $0x10] sm:$0xff]  ;;  %v296_v6 = vld [vmem:[%s1316_s10 + $0x28] sm:$0xff]  ;;  %s247_s7 = scalar_lea.vmem [#allocation8], %s721_s30  ;;  %s730_s11 = sshll.u32 %s1087_s15, 8 }
  0x7b   : > { %v298_v7 = vld [vmem:[%s1316_s10 + $0x38] sm:$0xff]  ;;  %v733_v8 = vpack.c.bf16 %v293_v5, %v291_v3  ;;  %v295_v10 = vld [vmem:[%s1316_s10 + $0x20] sm:$0xff]  ;;  %v297_v11 = vld [vmem:[%s1316_s10 + $0x30] sm:$0xff]  ;;  %s274_s27 = scalar_lea.vmem [#allocation9], %s722_s9  ;;  %s1424_s8 = scalar_lea.hbm %s1475_s3, %s730_s11 }
  0x7c   : > { %v735_v9 = vpack.c.bf16 %v298_v7, %v296_v6  ;;  %v300_v12 = vld [vmem:[%s1316_s10 + $0x48] sm:$0xff]  ;;  %732 = vmatprep.subr.bf16.mxu1 %v731_v4  ;;  %v302_v13 = vld [vmem:[%s1316_s10 + $0x58] sm:$0xff]  ;;  %v737_v14 = vpack.c.bf16 %v297_v11, %v295_v10  ;;  %v299_v16 = vld [vmem:[%s1316_s10 + $0x40] sm:$0xff]  ;;  %s585_s19 = sshll.u32 %s274_s27, 4  ;;  %s569_s22 = scalar_lea.sflag [#allocation5], %s1313_s25  ;;  %s1426_s19 = int_to_ptr.vmem [resolvable:$true] %s585_s19 }
  0x7d   : > { %734 = vmatpush1.bf16.msra.mxu1 %v733_v8  ;;  %v739_v15 = vpack.c.bf16 %v302_v13, %v300_v12  ;;  %v301_v17 = vld [vmem:[%s1316_s10 + $0x50] sm:$0xff]  ;;  %v304_v18 = vld [vmem:[%s1316_s10 + $0x68] sm:$0xff]  ;;  %v306_v19 = vld [vmem:[%s1316_s10 + $0x78] sm:$0xff]  ;;  %s1009_s15 = scalar_lea.vmem %s1426_s19, 256  ;;  %p1494_p12 = scmp.ne.s32.totalorder %s1485_s28, 0 }
  0x7e   : > { %736 = vmatprep.subr.bf16.mxu1 %v735_v9  ;;  %v741_v20 = vpack.c.bf16 %v301_v17, %v299_v16  ;;  %v743_v21 = vpack.c.bf16 %v306_v19, %v304_v18  ;;  %v303_v22 = vld [vmem:[%s1316_s10 + $0x60] sm:$0xff]  ;;  %v305_v23 = vld [vmem:[%s1316_s10 + $0x70] sm:$0xff]  ;;  %v308_v24 = vld [vmem:[%s1316_s10 + $0x88] sm:$0xff]  ;;  %p1010_p9 = scmp.ne.s32.totalorder %s1426_s19, %s1009_s15  ;;  %s1104_s29 = smov [#allocation9]  }
  0x7f   : > { %v310_v25 = vld [vmem:[%s1316_s10 + $0x98] sm:$0xff]  ;;  %v356_v26 = vld [vmem:[%s1316_s10 + $0x208] sm:$0xff]  ;;  %v745_v28 = vpack.c.bf16 %v305_v23, %v303_v22  ;;  %v307_v29 = vld [vmem:[%s1316_s10 + $0x80] sm:$0xff]  ;;  %s1013_s1 = sshll.u32 %s1104_s29, 4  ;;  %s1014_s1 = int_to_ptr.vmem [resolvable:$false] %s1013_s1 }
  0x80   : > { %v358_v27 = vld [vmem:[%s1316_s10 + $0x218] sm:$0xff]  ;;  %v355_v31 = vld [vmem:[%s1316_s10 + $0x200] sm:$0xff]  ;;  %v357_v32 = vld [vmem:[%s1316_s10 + $0x210] sm:$0xff]  ;;  %v747_v33 = vpack.c.bf16 %v310_v25, %v308_v24  ;;  %p1011_p13 = pnand %p1010_p9, %p1494_p12  ;;  %s1015_s5 = scalar_lea.vmem %s1014_s1, 512 }
  0x81   : > { %738 = vmatpush1.bf16.msra.mxu1 %v737_v14  ;;  %v795_v30 = vpack.c.bf16 %v358_v27, %v356_v26  ;;  %v309_v34 = vld [vmem:[%s1316_s10 + $0x90] sm:$0xff]  ;;  %v797_v35 = vpack.c.bf16 %v357_v32, %v355_v31  ;;  %v360_v36 = vld [vmem:[%s1316_s10 + $0x228] sm:$0xff]  ;;  %v362_v37 = vld [vmem:[%s1316_s10 + $0x238] sm:$0xff]  ;;  %p1016_p3 = scmp.lt.s32.totalorder %s1426_s19, %s1014_s1  ;;  %p1017_p1 = scmp.lt.s32.totalorder %s1015_s5, %s1009_s15 }
  0x82   : > { %740 = vmatprep.subr.bf16.mxu1 %v739_v15  ;;  %v312_v38 = vld [vmem:[%s1316_s10 + $0xa8] sm:$0xff]  ;;  %v314_v39 = vld [vmem:[%s1316_s10 + $0xb8] sm:$0xff]  ;;  %v799_v40 = vpack.c.bf16 %v362_v37, %v360_v36  ;;  %v359_v41 = vld [vmem:[%s1316_s10 + $0x220] sm:$0xff]  ;;  %v749_v43 = vpack.c.bf16 %v309_v34, %v307_v29  ;;  %p1012_p6 = pneg %p1011_p13 }
  0x83   : > { %796 = vmatprep.subr.bf16.mxu0 %v795_v30  ;;  %v361_v42 = vld [vmem:[%s1316_s10 + $0x230] sm:$0xff]  ;;  %v311_v44 = vld [vmem:[%s1316_s10 + $0xa0] sm:$0xff]  ;;  %v364_v46 = vld [vmem:[%s1316_s10 + $0x248] sm:$0xff]  ;;  %v751_v48 = vpack.c.bf16 %v314_v39, %v312_v38  ;;  %p1018_p10 = por %p1017_p1, %p1016_p3 }
  0x84   : > { %798 = vmatpush1.bf16.msra.mxu0 %v797_v35  ;;  %v801_v45 = vpack.c.bf16 %v361_v42, %v359_v41  ;;  %v366_v47 = vld [vmem:[%s1316_s10 + $0x258] sm:$0xff]  ;;  %v313_v49 = vld [vmem:[%s1316_s10 + $0xb0] sm:$0xff]  ;;  %v363_v51 = vld [vmem:[%s1316_s10 + $0x240] sm:$0xff] }
  0x85   : > { %742 = vmatpush1.bf16.msra.mxu1 %v741_v20  ;;  %800 = vmatprep.subr.bf16.mxu0 %v799_v40  ;;  %v803_v50 = vpack.c.bf16 %v366_v47, %v364_v46  ;;  %v365_v52 = vld [vmem:[%s1316_s10 + $0x250] sm:$0xff]  ;;  %v316_v53 = vld [vmem:[%s1316_s10 + $0xc8] sm:$0xff]  ;;  %v318_v54 = vld [vmem:[%s1316_s10 + $0xd8] sm:$0xff]  ;;  %v753_v58 = vpack.c.bf16 %v313_v49, %v311_v44  ;;  %p1019_p2 = pnand %p1018_p10, %p1012_p6 }
  0x86   : > { %744 = vmatprep.subr.bf16.mxu1 %v743_v21  ;;  %v368_v55 = vld [vmem:[%s1316_s10 + $0x268] sm:$0xff]  ;;  %v805_v56 = vpack.c.bf16 %v365_v52, %v363_v51  ;;  %v370_v57 = vld [vmem:[%s1316_s10 + $0x278] sm:$0xff]  ;;  %v315_v59 = vld [vmem:[%s1316_s10 + $0xc0] sm:$0xff]  ;;  %v755_v63 = vpack.c.bf16 %v318_v54, %v316_v53 }
  0x87   : > { %v807_v60 = vpack.c.bf16 %v370_v57, %v368_v55  ;;  %v367_v61 = vld [vmem:[%s1316_s10 + $0x260] sm:$0xff]  ;;  %v369_v62 = vld [vmem:[%s1316_s10 + $0x270] sm:$0xff]  ;;  %v372_v1 = vld [vmem:[%s1316_s10 + $0x288] sm:$0xff] }
  0x88   : > { %802 = vmatpush1.bf16.msra.mxu0 %v801_v45  ;;  %v317_v0 = vld [vmem:[%s1316_s10 + $0xd0] sm:$0xff]  ;;  %v374_v2 = vld [vmem:[%s1316_s10 + $0x298] sm:$0xff]  ;;  %v320_v3 = vld [vmem:[%s1316_s10 + $0xe8] sm:$0xff]  ;;  %v809_v5 = vpack.c.bf16 %v369_v62, %v367_v61 }
  0x89   : > { %746 = vmatpush1.bf16.msra.mxu1 %v745_v28  ;;  %804 = vmatprep.subr.bf16.mxu0 %v803_v50  ;;  %v322_v4 = vld [vmem:[%s1316_s10 + $0xf8] sm:$0xff]  ;;  %v757_v6 = vpack.c.bf16 %v317_v0, %v315_v59  ;;  %v319_v7 = vld [vmem:[%s1316_s10 + $0xe0] sm:$0xff]  ;;  %v811_v8 = vpack.c.bf16 %v374_v2, %v372_v1  ;;  %v373_v10 = vld [vmem:[%s1316_s10 + $0x290] sm:$0xff] }
  0x8a   : > { %748 = vmatprep.subr.bf16.mxu1 %v747_v33  ;;  %v371_v9 = vld [vmem:[%s1316_s10 + $0x280] sm:$0xff]  ;;  %v759_v11 = vpack.c.bf16 %v322_v4, %v320_v3  ;;  %v321_v12 = vld [vmem:[%s1316_s10 + $0xf0] sm:$0xff]  ;;  %v376_v13 = vld [vmem:[%s1316_s10 + $0x2a8] sm:$0xff] }
  0x8b   : > { %v378_v14 = vld [vmem:[%s1316_s10 + $0x2b8] sm:$0xff]  ;;  %v324_v15 = vld [vmem:[%s1316_s10 + $0x108] sm:$0xff]  ;;  %v813_v17 = vpack.c.bf16 %v373_v10, %v371_v9  ;;  %v761_v18 = vpack.c.bf16 %v321_v12, %v319_v7  ;;  %v323_v19 = vld [vmem:[%s1316_s10 + $0x100] sm:$0xff] }
  0x8c   : > { %806 = vmatpush1.bf16.msra.mxu0 %v805_v56  ;;  %v326_v16 = vld [vmem:[%s1316_s10 + $0x118] sm:$0xff]  ;;  %v815_v20 = vpack.c.bf16 %v378_v14, %v376_v13  ;;  %v375_v21 = vld [vmem:[%s1316_s10 + $0x2a0] sm:$0xff]  ;;  %v377_v22 = vld [vmem:[%s1316_s10 + $0x2b0] sm:$0xff] }
  0x8d   : > { %750 = vmatpush1.bf16.msra.mxu1 %v749_v43  ;;  %808 = vmatprep.subr.bf16.mxu0 %v807_v60  ;;  %v763_v23 = vpack.c.bf16 %v326_v16, %v324_v15  ;;  %v325_v24 = vld [vmem:[%s1316_s10 + $0x110] sm:$0xff]  ;;  %v380_v25 = vld [vmem:[%s1316_s10 + $0x2c8] sm:$0xff]  ;;  %v382_v26 = vld [vmem:[%s1316_s10 + $0x2d8] sm:$0xff]  ;;  %v817_v30 = vpack.c.bf16 %v377_v22, %v375_v21  ;;  %v540_v22 = vlaneseq }
  0x8e   : > { %752 = vmatprep.subr.bf16.mxu1 %v751_v48  ;;  %v328_v27 = vld [vmem:[%s1316_s10 + $0x128] sm:$0xff]  ;;  %v330_v28 = vld [vmem:[%s1316_s10 + $0x138] sm:$0xff]  ;;  %v327_v29 = vld [vmem:[%s1316_s10 + $0x120] sm:$0xff]  ;;  %v765_v31 = vpack.c.bf16 %v325_v24, %v323_v19  ;;  %v819_v32 = vpack.c.bf16 %v382_v26, %v380_v25 }
  0x8f   : > { %v379_v33 = vld [vmem:[%s1316_s10 + $0x2c0] sm:$0xff]  ;;  %v381_v34 = vld [vmem:[%s1316_s10 + $0x2d0] sm:$0xff]  ;;  %v767_v36 = vpack.c.bf16 %v330_v28, %v328_v27  ;;  %v384_v38 = vld [vmem:[%s1316_s10 + $0x2e8] sm:$0xff] }
  0x90   : > { %810 = vmatpush1.bf16.msra.mxu0 %v809_v5  ;;  %v289_v35 = vld [vmem:[#allocation3 + $0x8] sm:$0xff]  ;;  %v386_v39 = vld [vmem:[%s1316_s10 + $0x2f8] sm:$0xff]  ;;  %v332_v40 = vld [vmem:[%s1316_s10 + $0x148] sm:$0xff]  ;;  %v821_v42 = vpack.c.bf16 %v381_v34, %v379_v33 }
  0x91   : > { %754 = vmatpush1.bf16.msra.mxu1 %v753_v58  ;;  %812 = vmatprep.subr.bf16.mxu0 %v811_v8  ;;  %v329_v37 = vld [vmem:[%s1316_s10 + $0x130] sm:$0xff]  ;;  %v334_v41 = vld [vmem:[%s1316_s10 + $0x158] sm:$0xff]  ;;  %v823_v44 = vpack.c.bf16 %v386_v39, %v384_v38  ;;  %v383_v45 = vld [vmem:[%s1316_s10 + $0x2e0] sm:$0xff] }
  0x92   : > { %756 = vmatprep.subr.bf16.mxu1 %v755_v63  ;;  %451 = vmatprep.mubr.f32.mxu1 %v289_v35  ;;  %v769_v43 = vpack.c.bf16 %v329_v37, %v327_v29  ;;  %v385_v46 = vld [vmem:[%s1316_s10 + $0x2f0] sm:$0xff]  ;;  %v771_v47 = vpack.c.bf16 %v334_v41, %v332_v40  ;;  %v331_v48 = vld [vmem:[%s1316_s10 + $0x140] sm:$0xff]  ;;  %v336_v50 = vld [vmem:[%s1316_s10 + $0x168] sm:$0xff] }
  0x93   : > { %v333_v49 = vld [vmem:[%s1316_s10 + $0x150] sm:$0xff]  ;;  %v338_v51 = vld [vmem:[%s1316_s10 + $0x178] sm:$0xff]  ;;  %v825_v52 = vpack.c.bf16 %v385_v46, %v383_v45  ;;  %v335_v55 = vld [vmem:[%s1316_s10 + $0x160] sm:$0xff] }
  0x94   : > { %814 = vmatpush1.bf16.msra.mxu0 %v813_v17  ;;  %v773_v53 = vpack.c.bf16 %v333_v49, %v331_v48  ;;  %v775_v54 = vpack.c.bf16 %v338_v51, %v336_v50  ;;  %v337_v56 = vld [vmem:[%s1316_s10 + $0x170] sm:$0xff]  ;;  %v340_v57 = vld [vmem:[%s1316_s10 + $0x188] sm:$0xff]  ;;  %v342_v58 = vld [vmem:[%s1316_s10 + $0x198] sm:$0xff] }
  0x95   : > { %758 = vmatpush1.bf16.msra.mxu1 %v757_v6  ;;  %816 = vmatprep.subr.bf16.mxu0 %v815_v20  ;;  %v290_v59 = vld [vmem:[#allocation3 + $0x10] sm:$0xff]  ;;  %v777_v60 = vpack.c.bf16 %v337_v56, %v335_v55  ;;  %v779_v61 = vpack.c.bf16 %v342_v58, %v340_v57  ;;  %v339_v62 = vld [vmem:[%s1316_s10 + $0x180] sm:$0xff]  ;;  %v341_v63 = vld [vmem:[%s1316_s10 + $0x190] sm:$0xff] }
  0x96   : > { %760 = vmatprep.subr.bf16.mxu1 %v759_v11  ;;  %v344_v0 = vld [vmem:[%s1316_s10 + $0x1a8] sm:$0xff]  ;;  %v346_v1 = vld [vmem:[%s1316_s10 + $0x1b8] sm:$0xff]  ;;  %v781_v2 = vpack.c.bf16 %v341_v63, %v339_v62  ;;  %v343_v4 = vld [vmem:[%s1316_s10 + $0x1a0] sm:$0xff] }
  0x97   : > { %v783_v3 = vpack.c.bf16 %v346_v1, %v344_v0  ;;  %v345_v5 = vld [vmem:[%s1316_s10 + $0x1b0] sm:$0xff]  ;;  %v348_v6 = vld [vmem:[%s1316_s10 + $0x1c8] sm:$0xff]  ;;  %v350_v7 = vld [vmem:[%s1316_s10 + $0x1d8] sm:$0xff] }
  0x98   : > { %818 = vmatpush1.bf16.msra.mxu0 %v817_v30  ;;  %v785_v8 = vpack.c.bf16 %v345_v5, %v343_v4  ;;  %v787_v9 = vpack.c.bf16 %v350_v7, %v348_v6  ;;  %v347_v10 = vld [vmem:[%s1316_s10 + $0x1c0] sm:$0xff]  ;;  %v349_v11 = vld [vmem:[%s1316_s10 + $0x1d0] sm:$0xff]  ;;  %v352_v12 = vld [vmem:[%s1316_s10 + $0x1e8] sm:$0xff] }
  0x99   : > { %762 = vmatpush1.bf16.msra.mxu1 %v761_v18  ;;  %820 = vmatprep.subr.bf16.mxu0 %v819_v32  ;;  %v354_v13 = vld [vmem:[%s1316_s10 + $0x1f8] sm:$0xff]  ;;  %v789_v14 = vpack.c.bf16 %v349_v11, %v347_v10  ;;  %v351_v16 = vld [vmem:[%s1316_s10 + $0x1e0] sm:$0xff]  ;;  %v353_v17 = vld [vmem:[%s1316_s10 + $0x1f0] sm:$0xff] }
  0x9a   : > { %764 = vmatprep.subr.bf16.mxu1 %v763_v23  ;;  %v791_v15 = vpack.c.bf16 %v354_v13, %v352_v12  ;;  %v793_v18 = vpack.c.bf16 %v353_v17, %v351_v16  ;;  %v288_v19 = vld [vmem:[#allocation3] sm:$0xff]  ;;  %v541_v23 = vshrl.u32 %v540_v22, 7  ;;  %v538_v25 = vld [vmem:[%s247_s7] sm:$0x3] }
  0x9c   : > { %822 = vmatpush1.bf16.msra.mxu0 %v821_v42  ;;  %v542_v24 = vsub.s32 0, %v541_v23  ;;  %v546_v26 = vsub.s32 1, %v541_v23 }
  0x9d   : > { %766 = vmatpush1.bf16.msra.mxu1 %v765_v31  ;;  %824 = vmatprep.subr.bf16.mxu0 %v823_v44 }
  0x9e   : > { %768 = vmatprep.subr.bf16.mxu1 %v767_v36  ;;  %v543_v27 = vrot.slane %v538_v25, %v542_v24  ;;  %v547_v29 = vrot.slane %v538_v25, %v546_v26 }
  0xa0   : > { %826 = vmatpush1.bf16.msra.mxu0 %v825_v52 }
  0xa1   : > { %770 = vmatpush1.bf16.msra.mxu1 %v769_v43 }
  0xa2   : > { %772 = vmatprep.subr.bf16.mxu1 %v771_v47 }
  0xa3   : > { %523 = vmatmul.mubr.f32.vlgmr.msra.gmra.mrb[0].mxu0 %v290_v59 }
  0xa5   : > { %774 = vmatpush1.bf16.msra.mxu1 %v773_v53 }
  0xa6   : > { %776 = vmatprep.subr.bf16.mxu1 %v775_v54 }
  0xa9   : > { %778 = vmatpush1.bf16.msra.mxu1 %v777_v60 }
  0xaa   : > { %780 = vmatprep.subr.bf16.mxu1 %v779_v61 }
  0xad   : > { %782 = vmatpush1.bf16.msra.mxu1 %v781_v2 }
  0xae   : > { %784 = vmatprep.subr.bf16.mxu1 %v783_v3 }
  0xb1   : > { %786 = vmatpush1.bf16.msra.mxu1 %v785_v8 }
  0xb2   : > { %788 = vmatprep.subr.bf16.mxu1 %v787_v9 }
  0xb5   : > { %790 = vmatpush1.bf16.msra.mxu1 %v789_v14 }
  0xb6   : > { %792 = vmatprep.subr.bf16.mxu1 %v791_v15 }
  0xb9   : > { %794 = vmatpush1.bf16.msra.mxu1 %v793_v18 }
  0xbc   : > { %452 = vmatmul.mubr.f32.vlgmr.msra.gmra.mrb[0].mxu1 %v288_v19 }
 0x176   : > { %v524_v20 = vpop.f32.mrb[0].mxu0 }
 0x177   : > { %v526_v21 = vpop.f32.mrb[1].mxu0 }
 0x18f   : > { %v453_v28 = vpop.f32.mrb[0].mxu1 }
 0x190   : > { %v525_v30 = vadd.f32 %v524_v20, %v453_v28  ;;  %v455_v31 = vpop.f32.mrb[1].mxu1 }
 0x191   : > { %v527_v32 = vadd.f32 %v526_v21, %v455_v31 }
 0x192   : > { %v550_v33 = vadd.f32 %v543_v27, %v525_v30 }
 0x193   : > { %v551_v34 = vadd.f32 %v547_v29, %v527_v32 }
 0x194   : > { %v552_v35 = vsub.f32 0.0, %v550_v33 }
 0x195   : > { %v553_v36 = vsub.f32 0.0, %v551_v34 }
 0x196   : > { %v554_v37 = vmul.f32 1.442695, %v552_v35 }
 0x197   : > { %v556_v38 = vmul.f32 1.442695, %v553_v36 }
 0x198   : > { %913 = vpow2.f32 %v554_v37 }
 0x199   : > { %915 = vpow2.f32 %v556_v38 }
 0x1a2   : > { %v914_v39 = vpop.eup %913 }
 0x1a3   : > { %v916_v40 = vpop.eup %915  ;;  %v558_v41 = vadd.f32 1.0, %v914_v39 }
 0x1a4   : > { %v559_v42 = vadd.f32 1.0, %v916_v40 }
 0x1a5   : > { %917 = vrcp.f32 %v558_v41 }
 0x1a6   : > { %919 = vrcp.f32 %v559_v42 }
 0x1af   : > { %v918_v43 = vpop.eup %917 }
 0x1b0   : > { %v920_v44 = vpop.eup %919  ;;  %v564_v45 = vmul.f32 %v918_v43, %v550_v33 }
 0x1b1   : > { %v565_v46 = vmul.f32 %v920_v44, %v551_v34 }
 0x1b2   : > { %566 = vst [vmem:[%s274_s27] sm:$0xff] %v564_v45 }
 0x1b3   : > { %567 = vst [vmem:[%s274_s27 + $0x8] sm:$0xff] %v565_v46 }
 0x1b4   : > { %1022 = shalt.err (!%p1019_p2)
}
 0x1b5   : > { %s1023_s23 = scalar_lea.hbm %s1424_s8, 256  ;;  %s1027_s6 = scalar_lea.hbm %s1475_s3, 1280 }
 0x1b6   : > { %p1024_p5 = scmp.ne.s32.totalorder %s1424_s8, %s1023_s23  ;;  %p1028_p7 = scmp.lt.u32.totalorder %s1424_s8, %s1475_s3 }
 0x1b7   : > { %p1029_p4 = scmp.lt.u32.totalorder %s1027_s6, %s1023_s23  ;;  %p1031_p9 = scmp.lt.u32.totalorder %s1023_s23, %s1424_s8 }
 0x1b8   : > { %p1025_p11 = pnand %p1024_p5, %p1494_p12 }
 0x1b9   : > { %p1030_p0 = por %p1029_p4, %p1028_p7 }
 0x1ba   : > { %p1026_p8 = pneg %p1025_p11 }
 0x1bb   : > { %p1032_p13 = por %p1031_p9, %p1030_p0 }
 0x1bd   : > { %p1033_p6 = pnand %p1032_p13, %p1026_p8 }
 0x1bf   : > { %1036 = shalt.err (!%p1033_p6)
}
 0x1c0   : > { %839 = dma.vmem_to_hbm [thread:$0]  (%p1494_p12), %s1426_s19, 256, %s1424_s8, %s569_s22  }
 0x1c1 PF: > { %p859_p3 = scmp.ge.s32.totalorder %s1095_s17, 2  ;;  %s597_s7 = sand.u32 1, %s1075_s12  }
 0x1c2   : > { %p1495_p1 = scmp.ne.s32.totalorder %s1486_s4, 0  ;;  %s598_s9 = scalar_lea.sflag [#allocation5], %s597_s7 }
 0x1c4   : > { %p853_p10 = pnand %p859_p3, %p1495_p1 }
 0x1c6   : > { %1070 = dma.done.wait (!%p853_p10), %s598_s9, 256  }
 0x1c7   : > { %1072 = vsyncadd (!%p853_p10), %s598_s9, 4294967040  ;;  %s20_s17 = sadd.s32 1, %s1095_s17   ;;  %s1496_s12 = smov %s1079_s13 }
 0x1c8   : > { %p17_p2 = scmp.ge.s32.totalorder %s20_s17, 7   ;;  %s1497_s13 = smov %s1083_s14 }
 0x1c9   : > { %s1498_s14 = smov %s1172_s24  ;;  %s1499_s15 = smov %s1091_s16 }
 0x1ca   : > { %s1500_s16 = smov %s1502_s18  ;;  %19 = sbr.rel (!%p17_p2) target bundleno = 9 (0x9), region = 102 }
 0x1d1   :  { %603 = vsyncpa [#allocation4], 1 }
 0x1d2   :  { %605 = vsyncpa [#allocation4 + $0x1], 1 }
 0x1d3   :  { %606 = vsyncpa [#allocation7], 1 }
 0x1d4   :  { %608 = vsyncpa [#allocation7 + $0x1], 1 }
 0x1d5   :  { %609 = vsyncpa [#allocation5], 1 }
 0x1d6   :  { %611 = vsyncpa [#allocation5 + $0x1], 1 }

</bundles_post_ra>
